<compile_context>
chip_gen: v7x
topology: tpu7x:2x2x1
jax: 0.10.0
libtpu: 0.0.40
codegen_flags: <defaults>
</compile_context>

<pallas_src>
import functools

import jax
import jax.numpy as jnp
import numpy as np
from jax.experimental import pallas as pl
from jax.experimental.pallas import tpu as pltpu


# ----------------------------------------------------------------------------
# One-time capability probes (fixed small shapes, cached per process).
# ----------------------------------------------------------------------------
@functools.lru_cache(maxsize=None)
def _lane_reverse_supported():
    """Is lax.rev (lane reversal, x[..., ::-1]) lowerable on this Mosaic?"""

    def probe_kernel(x_ref, o4_ref, o3_ref):
        o4_ref[...] = x_ref[...][..., ::-1]      # rank-4 reverse on lane axis
        o3_ref[...] = x_ref[0][..., ::-1]        # rank-3 reverse on lane axis

    try:
        B, C, H, W = 2, 2, 8, 16
        x = jnp.arange(B * C * H * W, dtype=jnp.float32).reshape(B, C, H, W)
        o4, o3 = pl.pallas_call(
            probe_kernel,
            out_shape=(jax.ShapeDtypeStruct((B, C, H, W), jnp.float32),
                       jax.ShapeDtypeStruct((C, H, W), jnp.float32)),
        )(x)
        jax.block_until_ready((o4, o3))
        xn = np.asarray(x)
        return (np.array_equal(np.asarray(o4), xn[..., ::-1])
                and np.array_equal(np.asarray(o3), xn[0][..., ::-1]))
    except Exception:
        return False


@functools.lru_cache(maxsize=None)
def _buffered_pipeline_supported():
    """Does pipeline_mode=pl.Buffered(3) lower together with
    PrefetchScalarGridSpec and squeezed block dims on this build?"""
    try:
        buf = pl.Buffered(3)

        def probe_kernel(fi_ref, x_ref, o_ref):
            del fi_ref
            o_ref[...] = x_ref[...]

        K, H, W = 4, 8, 128
        x = jnp.arange(K * H * W, dtype=jnp.float32).reshape(1, K, H, W)
        fi = jnp.arange(K, dtype=jnp.int32)
        gs = pltpu.PrefetchScalarGridSpec(
            num_scalar_prefetch=1,
            grid=(K,),
            in_specs=[pl.BlockSpec((1, None, H, W),
                                   lambda k, fi: (0, fi[k], 0, 0),
                                   pipeline_mode=buf)],
            out_specs=pl.BlockSpec((1, None, H, W),
                                   lambda k, fi: (0, k, 0, 0),
                                   pipeline_mode=buf),
        )
        out = pl.pallas_call(
            probe_kernel,
            out_shape=jax.ShapeDtypeStruct(x.shape, x.dtype),
            grid_spec=gs,
            compiler_params=pltpu.CompilerParams(
                dimension_semantics=("parallel",)),
        )(fi, x)
        jax.block_until_ready(out)
        return bool(np.array_equal(np.asarray(out), np.asarray(x)))
    except Exception:
        return False


def _rev_matrix_host(w, dtype):
    """Anti-diagonal 0/1 permutation matrix (fallback MXU flip): (x @ rev)
    reverses the last axis.  Built once on the host, kept VMEM-resident
    (constant block index -> never refetched).  Kept in the native field dtype
    (bf16/f32) with f32 accumulation: exact for a 0/1 permutation.  Note:
    integer fields with |x| > 2^24 would lose precision here; openpifpaf
    fields are float."""
    rows = np.arange(w)[:, None]
    cols = np.arange(w)[None, :]
    m = (rows + cols == w - 1).astype(np.float32)
    d = jnp.dtype(dtype)
    if not jnp.issubdtype(d, jnp.floating):
        d = jnp.dtype(jnp.float32)
    return jnp.asarray(m, dtype=d)


# ----------------------------------------------------------------------------
# Fused kernel: all head fields of one shape/dtype group in a single launch.
# ----------------------------------------------------------------------------
def _hflip_fused_kernel(fi_ref, *refs, negate_flags, use_rev):
    """Per grid step k the refs are, in order:
         inputs : one block per field
                    4-D field            -> (B, H, W)     (K dim squeezed)
                    5-D field (as K*C)   -> (B, C, H, W)  (all C components
                                             of keypoint flip_indices[k])
         [rev]  : (W, W) reversal matrix (MXU fallback only)
         outputs: same block shapes as the inputs, at keypoint k.
    The keypoint gather already happened via the scalar-prefetched input
    index_map (fi_ref)."""
    del fi_ref
    n = len(negate_flags)
    if use_rev:
        ins, outs = refs[:n], refs[n:]
        rev = None
    else:
        ins, rev_ref, outs = refs[:n], refs[n], refs[n + 1:]
        rev = rev_ref[...]

    for neg, x_ref, o_ref in zip(negate_flags, ins, outs):
        if use_rev:
            v = x_ref[...][..., ::-1]                    # XLU lane reversal
        else:
            # One batched matmul per field: (rows, W) @ (W, W) fills the MXU's
            # M dimension instead of many tiny per-b / per-c matmuls.
            shp = x_ref.shape
            xin = x_ref[...]
            if xin.dtype != rev.dtype:
                xin = xin.astype(rev.dtype)
            v = jnp.dot(xin.reshape(-1, shp[-1]), rev,
                        preferred_element_type=jnp.float32)
            v = v.reshape(shp).astype(o_ref.dtype)

        if neg:
            # 5-D regression field, block (B, C, H, W): negate the x-offset
            # component.  Two disjoint static-slice stores, fused in-kernel.
            o_ref[:, 0:1] = -v[:, 0:1]
            if v.shape[1] > 1:
                o_ref[:, 1:] = v[:, 1:]
        else:
            o_ref[...] = v


def _hflip_group_fused(flip_indices, fields, negate_flags):
    """One pallas_call for every field in the group (shared B, K, H, W, dtype).
    5-D fields are reshaped to (B, K*C, H, W) in the wrapper (free: C is
    contiguous under K), so block index fi[k] over C-row blocks reproduces the
    per-keypoint gather."""
    use_rev = _lane_reverse_supported()
    buffered = _buffered_pipeline_supported()

    def _spec(block_shape, index_map):
        if buffered:
            # Per-step compute is ~0 and blocks are KBs: triple-buffering is
            # essentially free in VMEM and keeps more DMAs in flight.
            return pl.BlockSpec(block_shape, index_map,
                                pipeline_mode=pl.Buffered(3))
        return pl.BlockSpec(block_shape, index_map)

    in_specs, out_specs, operands, out_shapes, orig_shapes = [], [], [], [], []
    K = W = None
    for f in fields:
        if f.ndim == 4:
            B, K, H, W = f.shape
            in_specs.append(_spec((B, None, H, W),
                                  lambda k, fi: (0, fi[k], 0, 0)))
            out_specs.append(_spec((B, None, H, W),
                                   lambda k, fi: (0, k, 0, 0)))
            operands.append(f)
            out_shapes.append(jax.ShapeDtypeStruct(f.shape, f.dtype))
        else:  # 5-D: (B, K, C, H, W) -> (B, K*C, H, W)
            B, K, C, H, W = f.shape
            operands.append(f.reshape(B, K * C, H, W))
            in_specs.append(_spec((B, C, H, W),
                                  lambda k, fi: (0, fi[k], 0, 0)))
            out_specs.append(_spec((B, C, H, W),
                                   lambda k, fi: (0, k, 0, 0)))
            out_shapes.append(jax.ShapeDtypeStruct((B, K * C, H, W), f.dtype))
        orig_shapes.append(f.shape)

    if not use_rev:
        # Constant block index -> stays VMEM-resident, no deep buffering.
        in_specs.append(pl.BlockSpec((W, W), lambda k, fi: (0, 0)))
        operands.append(_rev_matrix_host(int(W), fields[0].dtype))

    gs = pltpu.PrefetchScalarGridSpec(
        num_scalar_prefetch=1,
        grid=(int(K),),
        in_specs=in_specs,
        out_specs=out_specs,
    )
    kernel = functools.partial(
        _hflip_fused_kernel,
        negate_flags=tuple(bool(x) for x in negate_flags),
        use_rev=use_rev)
    outs = pl.pallas_call(
        kernel,
        out_shape=out_shapes,
        grid_spec=gs,
        # Disjoint output blocks per k -> "parallel" (v7x shards K over its
        # two TensorCores; B and C stay folded into the block, not the grid).
        compiler_params=pltpu.CompilerParams(
            dimension_semantics=("parallel",)),
    )(flip_indices, *operands)

    return [o if len(s) == 4 else o.reshape(s)
            for o, s in zip(outs, orig_shapes)]


# ----------------------------------------------------------------------------
# Modules
# ----------------------------------------------------------------------------
class PifHFlip:
    """openpifpaf PifHFlip (the Shell.process_heads step), Pallas-backed."""

    def __init__(self, keypoints, hflip):
        self.flip_indices = jnp.asarray(
            [keypoints.index(hflip[kp_name]) if kp_name in hflip else kp_i
             for kp_i, kp_name in enumerate(keypoints)],
            dtype=jnp.int32)

    def __call__(self, *fields):
        if len(fields) == 1 and isinstance(fields[0], (list, tuple)):
            fields = tuple(fields[0])
        if len(fields) >= 2 and fields[1].ndim != 5:
            raise ValueError("field 1 must be the 5-D regression field "
                             "(its x-component gets negated)")

        out = [None] * len(fields)
        # Fuse every field that shares (B, K, H, W) and dtype into ONE launch
        # (4-D maps and the 5-D regression field together).
        groups = {}
        for i, f in enumerate(fields):
            if f.ndim == 4:
                B, K, H, W = f.shape
            elif f.ndim == 5:
                B, K, _, H, W = f.shape
            else:
                raise ValueError(f"unsupported field rank: {f.ndim}")
            key = (B, K, H, W, jnp.dtype(f.dtype).name)
            groups.setdefault(key, []).append(i)

        for idxs in groups.values():
            results = _hflip_group_fused(
                self.flip_indices,
                [fields[i] for i in idxs],
                [(i == 1 and fields[i].ndim == 5) for i in idxs])
            for i, r in zip(idxs, results):
                out[i] = r
        return out


class Shell:
    """JAX port of openpifpaf's Shell container.

    base_net and the head nets are arbitrary user-supplied modules in the
    original; they are treated as opaque callables here.  process_heads
    (PifHFlip) is the Pallas TPU kernel above.
    """

    def __init__(self, base_net, head_nets, *, process_heads=None,
                 cross_talk=0.0):
        # TODO(synk): base_net / head_nets are arbitrary nn.Modules in the
        # original; they are opaque callables here, not Pallas kernels.
        self.base_net = base_net
        self.head_nets = list(head_nets)
        self.process_heads = process_heads
        self.cross_talk = cross_talk
        self.training = False

    def __call__(self, *args):
        image_batch = args[0]
        if self.training and self.cross_talk:
            rolled = jnp.concatenate([image_batch[-1:], image_batch[:-1]],
                                     axis=0)
            image_batch = image_batch + rolled * self.cross_talk
        x = self.base_net(image_batch)
        head_outputs = [hn(x) for hn in self.head_nets]
        if self.process_heads is not None:
            head_outputs = self.process_heads(head_outputs)
        return head_outputs


# ----------------------------------------------------------------------------
# Pure-JAX reference of the process_heads step (matches the PyTorch code)
# ----------------------------------------------------------------------------
def _ref_process_heads(flip_indices, fields):
    out = []
    for f in fields:
        f = jnp.take(f, flip_indices, axis=1)
        f = jnp.flip(f, axis=-1)
        out.append(f)
    out[1] = out[1].at[:, :, 0, :, :].multiply(-1.0)
    return out


if __name__ == "__main__":
    keypoints = ["nose", "left_eye", "right_eye", "left_ear", "right_ear"]
    hflip_map = {
        "left_eye": "right_eye", "right_eye": "left_eye",
        "left_ear": "right_ear", "right_ear": "left_ear",
    }

    B, K, H, W = 2, len(keypoints), 16, 16
    key = jax.random.PRNGKey(0)
    k0, k1, k2, k3 = jax.random.split(key, 4)
    intensity = jax.random.normal(k0, (B, K, H, W), dtype=jnp.float32)
    regression = jax.random.normal(k1, (B, K, 2, H, W), dtype=jnp.float32)
    scale_field = jax.random.normal(k2, (B, K, H, W), dtype=jnp.float32)
    image = jax.random.normal(k3, (B, 3, H, W), dtype=jnp.float32)

    # Stand-in base net (identity features) and head nets producing the
    # deterministic PIF fields above.
    base_net = lambda img: img
    head_nets = [lambda feat, a=intensity: a,
                 lambda feat, a=regression: a,
                 lambda feat, a=scale_field: a]

    pif_hflip = PifHFlip(keypoints, hflip_map)
    shell = Shell(base_net, head_nets, process_heads=pif_hflip)

    out = shell(image)
    out = [jax.block_until_ready(o) for o in out]

    ref = _ref_process_heads(pif_hflip.flip_indices,
                             [intensity, regression, scale_field])
    for got, want in zip(out, ref):
        np.testing.assert_allclose(np.asarray(got), np.asarray(want),
                                   rtol=1e-6, atol=1e-6)

    print("KERNEL_OK")
</pallas_src>

<mosaic_0001>
module attributes {stable_mosaic.version = 11 : i64} {
  func.func @_hflip_fused_kernel(%arg0: i32, %arg1: memref<5xi32, #tpu.memory_space<smem>>, %arg2: memref<2x1x16x16xf32, #tpu.memory_space<vmem>>, %arg3: memref<2x2x16x16xf32, #tpu.memory_space<vmem>>, %arg4: memref<2x1x16x16xf32, #tpu.memory_space<vmem>>, %arg5: memref<16x16xf32, #tpu.memory_space<vmem>>, %arg6: memref<2x1x16x16xf32, #tpu.memory_space<vmem>>, %arg7: memref<2x2x16x16xf32, #tpu.memory_space<vmem>>, %arg8: memref<2x1x16x16xf32, #tpu.memory_space<vmem>>) attributes {dimension_semantics = [#tpu.dimension_semantics<parallel>], iteration_bounds = array<i64: 5>, scalar_prefetch = 1 : i64, scratch_operands = 0 : i64, tpu.core_type = #tpu.core_type<tc>, window_params = [{transform_indices = @transform_0, window_bounds = array<i64: 2, 1, 16, 16>}, {transform_indices = @transform_1, window_bounds = array<i64: 2, 2, 16, 16>}, {transform_indices = @transform_2, window_bounds = array<i64: 2, 1, 16, 16>}, {pipeline_mode = #tpu.pipeline_mode<synchronous>, transform_indices = @transform_3, window_bounds = array<i64: 16, 16>}, {transform_indices = @transform_4, window_bounds = array<i64: 2, 1, 16, 16>}, {transform_indices = @transform_5, window_bounds = array<i64: 2, 2, 16, 16>}, {transform_indices = @transform_6, window_bounds = array<i64: 2, 1, 16, 16>}]} {
    %c0 = arith.constant 0 : index
    %c0_0 = arith.constant 0 : index
    %0 = vector.load %arg5[%c0, %c0_0] : memref<16x16xf32, #tpu.memory_space<vmem>>, vector<16x16xf32>
    %c0_1 = arith.constant 0 : index
    %c0_2 = arith.constant 0 : index
    %c0_3 = arith.constant 0 : index
    %c0_4 = arith.constant 0 : index
    %1 = vector.load %arg2[%c0_1, %c0_2, %c0_3, %c0_4] : memref<2x1x16x16xf32, #tpu.memory_space<vmem>>, vector<2x1x16x16xf32>
    %2 = vector.shape_cast %1 : vector<2x1x16x16xf32> to vector<2x16x16xf32>
    %3 = vector.shape_cast %2 : vector<2x16x16xf32> to vector<32x16xf32>
    %cst = arith.constant dense<0.000000e+00> : vector<32x16xf32>
    %4 = tpu.matmul %3, %0, %cst {dimension_numbers = #tpu.dot_dimension_numbers<[1], [0], [0], [1], [0, 0, 1, 1], [], []>} : vector<32x16xf32>, vector<16x16xf32>, vector<32x16xf32> -> vector<32x16xf32>
    %5 = vector.shape_cast %4 : vector<32x16xf32> to vector<2x16x16xf32>
    %c0_5 = arith.constant 0 : index
    %c0_6 = arith.constant 0 : index
    %c0_7 = arith.constant 0 : index
    %c0_8 = arith.constant 0 : index
    %6 = vector.load %arg6[%c0_5, %c0_6, %c0_7, %c0_8] : memref<2x1x16x16xf32, #tpu.memory_space<vmem>>, vector<2x1x16x16xf32>
    %7 = vector.shape_cast %6 : vector<2x1x16x16xf32> to vector<2x16x16xf32>
    %8 = vector.shape_cast %5 : vector<2x16x16xf32> to vector<2x1x16x16xf32>
    tpu.vector_store %arg6[%c0_5, %c0_6, %c0_7, %c0_8], %8 {strides = array<i32>} : memref<2x1x16x16xf32, #tpu.memory_space<vmem>>, vector<2x1x16x16xf32>,
    %c0_9 = arith.constant 0 : index
    %c0_10 = arith.constant 0 : index
    %c0_11 = arith.constant 0 : index
    %c0_12 = arith.constant 0 : index
    %9 = vector.load %arg3[%c0_9, %c0_10, %c0_11, %c0_12] : memref<2x2x16x16xf32, #tpu.memory_space<vmem>>, vector<2x2x16x16xf32>
    %10 = vector.shape_cast %9 : vector<2x2x16x16xf32> to vector<64x16xf32>
    %cst_13 = arith.constant dense<0.000000e+00> : vector<64x16xf32>
    %11 = tpu.matmul %10, %0, %cst_13 {dimension_numbers = #tpu.dot_dimension_numbers<[1], [0], [0], [1], [0, 0, 1, 1], [], []>} : vector<64x16xf32>, vector<16x16xf32>, vector<64x16xf32> -> vector<64x16xf32>
    %12 = vector.shape_cast %11 : vector<64x16xf32> to vector<2x2x16x16xf32>
    %13 = vector.extract_strided_slice %12 {offsets = [0, 0, 0, 0], sizes = [2, 1, 16, 16], strides = [1, 1, 1, 1]} : vector<2x2x16x16xf32> to vector<2x1x16x16xf32>
    %cst_14 = arith.constant 0.000000e+00 : f32
    %14 = vector.broadcast %cst_14 : f32 to vector<2x1x16x16xf32>
    %15 = arith.subf %14, %13 : vector<2x1x16x16xf32>
    %c0_15 = arith.constant 0 : index
    %c0_16 = arith.constant 0 : index
    %c0_17 = arith.constant 0 : index
    %c0_18 = arith.constant 0 : index
    %16 = vector.load %arg7[%c0_15, %c0_16, %c0_17, %c0_18] : memref<2x2x16x16xf32, #tpu.memory_space<vmem>>, vector<2x1x16x16xf32>
    tpu.vector_store %arg7[%c0_15, %c0_16, %c0_17, %c0_18], %15 {strides = array<i32>} : memref<2x2x16x16xf32, #tpu.memory_space<vmem>>, vector<2x1x16x16xf32>,
    %17 = vector.extract_strided_slice %12 {offsets = [0, 1, 0, 0], sizes = [2, 1, 16, 16], strides = [1, 1, 1, 1]} : vector<2x2x16x16xf32> to vector<2x1x16x16xf32>
    %c0_19 = arith.constant 0 : index
    %c1 = arith.constant 1 : index
    %c0_20 = arith.constant 0 : index
    %c0_21 = arith.constant 0 : index
    %18 = vector.load %arg7[%c0_19, %c1, %c0_20, %c0_21] : memref<2x2x16x16xf32, #tpu.memory_space<vmem>>, vector<2x1x16x16xf32>
    tpu.vector_store %arg7[%c0_19, %c1, %c0_20, %c0_21], %17 {strides = array<i32>} : memref<2x2x16x16xf32, #tpu.memory_space<vmem>>, vector<2x1x16x16xf32>,
    %c0_22 = arith.constant 0 : index
    %c0_23 = arith.constant 0 : index
    %c0_24 = arith.constant 0 : index
    %c0_25 = arith.constant 0 : index
    %19 = vector.load %arg4[%c0_22, %c0_23, %c0_24, %c0_25] : memref<2x1x16x16xf32, #tpu.memory_space<vmem>>, vector<2x1x16x16xf32>
    %20 = vector.shape_cast %19 : vector<2x1x16x16xf32> to vector<2x16x16xf32>
    %21 = vector.shape_cast %20 : vector<2x16x16xf32> to vector<32x16xf32>
    %cst_26 = arith.constant dense<0.000000e+00> : vector<32x16xf32>
    %22 = tpu.matmul %21, %0, %cst_26 {dimension_numbers = #tpu.dot_dimension_numbers<[1], [0], [0], [1], [0, 0, 1, 1], [], []>} : vector<32x16xf32>, vector<16x16xf32>, vector<32x16xf32> -> vector<32x16xf32>
    %23 = vector.shape_cast %22 : vector<32x16xf32> to vector<2x16x16xf32>
    %c0_27 = arith.constant 0 : index
    %c0_28 = arith.constant 0 : index
    %c0_29 = arith.constant 0 : index
    %c0_30 = arith.constant 0 : index
    %24 = vector.load %arg8[%c0_27, %c0_28, %c0_29, %c0_30] : memref<2x1x16x16xf32, #tpu.memory_space<vmem>>, vector<2x1x16x16xf32>
    %25 = vector.shape_cast %24 : vector<2x1x16x16xf32> to vector<2x16x16xf32>
    %26 = vector.shape_cast %23 : vector<2x16x16xf32> to vector<2x1x16x16xf32>
    tpu.vector_store %arg8[%c0_27, %c0_28, %c0_29, %c0_30], %26 {strides = array<i32>} : memref<2x1x16x16xf32, #tpu.memory_space<vmem>>, vector<2x1x16x16xf32>,
    return
  }
  func.func @transform_0(%arg0: i32, %arg1: memref<5xi32, #tpu.memory_space<smem>>) -> (i32, i32, i32, i32) {
    %0 = arith.index_cast %arg0 : i32 to index
    %1 = memref.load %arg1[%0] : memref<5xi32, #tpu.memory_space<smem>>
    %c0_i32 = arith.constant 0 : i32
    %c0_i32_0 = arith.constant 0 : i32
    %c0_i32_1 = arith.constant 0 : i32
    %c0_i32_2 = arith.constant 0 : i32
    return %c0_i32, %1, %c0_i32_0, %c0_i32_1 : i32, i32, i32, i32
  }
  func.func @transform_1(%arg0: i32, %arg1: memref<5xi32, #tpu.memory_space<smem>>) -> (i32, i32, i32, i32) {
    %0 = arith.index_cast %arg0 : i32 to index
    %1 = memref.load %arg1[%0] : memref<5xi32, #tpu.memory_space<smem>>
    %c0_i32 = arith.constant 0 : i32
    %c0_i32_0 = arith.constant 0 : i32
    %c0_i32_1 = arith.constant 0 : i32
    %c0_i32_2 = arith.constant 0 : i32
    return %c0_i32, %1, %c0_i32_0, %c0_i32_1 : i32, i32, i32, i32
  }
  func.func @transform_2(%arg0: i32, %arg1: memref<5xi32, #tpu.memory_space<smem>>) -> (i32, i32, i32, i32) {
    %0 = arith.index_cast %arg0 : i32 to index
    %1 = memref.load %arg1[%0] : memref<5xi32, #tpu.memory_space<smem>>
    %c0_i32 = arith.constant 0 : i32
    %c0_i32_0 = arith.constant 0 : i32
    %c0_i32_1 = arith.constant 0 : i32
    %c0_i32_2 = arith.constant 0 : i32
    return %c0_i32, %1, %c0_i32_0, %c0_i32_1 : i32, i32, i32, i32
  }
  func.func @transform_3(%arg0: i32, %arg1: memref<5xi32, #tpu.memory_space<smem>>) -> (i32, i32) {
    %c0_i32 = arith.constant 0 : i32
    %c0_i32_0 = arith.constant 0 : i32
    %c0_i32_1 = arith.constant 0 : i32
    return %c0_i32, %c0_i32_0 : i32, i32
  }
  func.func @transform_4(%arg0: i32, %arg1: memref<5xi32, #tpu.memory_space<smem>>) -> (i32, i32, i32, i32) {
    %c0_i32 = arith.constant 0 : i32
    %c0_i32_0 = arith.constant 0 : i32
    %c0_i32_1 = arith.constant 0 : i32
    %c0_i32_2 = arith.constant 0 : i32
    return %c0_i32, %arg0, %c0_i32_0, %c0_i32_1 : i32, i32, i32, i32
  }
  func.func @transform_5(%arg0: i32, %arg1: memref<5xi32, #tpu.memory_space<smem>>) -> (i32, i32, i32, i32) {
    %c0_i32 = arith.constant 0 : i32
    %c0_i32_0 = arith.constant 0 : i32
    %c0_i32_1 = arith.constant 0 : i32
    %c0_i32_2 = arith.constant 0 : i32
    return %c0_i32, %arg0, %c0_i32_0, %c0_i32_1 : i32, i32, i32, i32
  }
  func.func @transform_6(%arg0: i32, %arg1: memref<5xi32, #tpu.memory_space<smem>>) -> (i32, i32, i32, i32) {
    %c0_i32 = arith.constant 0 : i32
    %c0_i32_0 = arith.constant 0 : i32
    %c0_i32_1 = arith.constant 0 : i32
    %c0_i32_2 = arith.constant 0 : i32
    return %c0_i32, %arg0, %c0_i32_0, %c0_i32_1 : i32, i32, i32, i32
  }
}

</mosaic_0001>

<bundles_post_ra>
// kernel: tpu_custom_call.1
= control target key start
LH: loop header
LB: loop body
LE: loop exit
PB: predicated region body
PF: predicated region fallthrough
CT: control target
= control target key end

     0   :  { %s2281_s0 = inlined_call_operand.hbm [shape: s32[5], index: 0, kind: input, shape index: {}]   ;;  %s2282_s1 = inlined_call_operand.hbm [shape: f32[2,5,16,16], index: 1, kind: input, shape index: {}]   ;;  %s2283_s2 = inlined_call_operand.hbm [shape: f32[2,10,16,16], index: 2, kind: input, shape index: {}]   ;;  %s2284_s3 = inlined_call_operand.hbm [shape: f32[2,5,16,16], index: 3, kind: input, shape index: {}]   ;;  %s2285_s4 = inlined_call_operand.hbm [shape: f32[16,16], index: 4, kind: input, shape index: {}]   ;;  %s2286_s5 = inlined_call_operand.hbm [shape: f32[2,5,16,16], index: 5, kind: output, shape index: {0}]   ;;  %s2287_s6 = inlined_call_operand.hbm [shape: f32[2,10,16,16], index: 6, kind: output, shape index: {1}]   ;;  %s2288_s7 = inlined_call_operand.hbm [shape: f32[2,5,16,16], index: 7, kind: output, shape index: {2}]  }
   0x1   :  { %2308 = sst [smem:[#allocation53_spill]] %s2285_s4  ;;  %s1532_s26 = scalar_lea.hbm %s2281_s0, 16 }
   0x2   :  { %2309 = sst [smem:[#allocation54_spill]] %s2286_s5  ;;  %p1533_p0 = scmp.ne.s32.totalorder %s2281_s0, %s1532_s26 }
   0x3   :  { %2310 = sst [smem:[#allocation55_spill]] %s2287_s6  ;;  %p1536_p1 = scmp.lt.u32.totalorder %s1532_s26, %s2281_s0 }
   0x4   :  { %2311 = sst [smem:[#allocation56_spill]] %s2288_s7 }
   0x5   :  { %p1538_p2 = pnand %p1536_p1, %p1533_p0 }
   0x7   :  { %1541 = shalt.err (!%p1538_p2)  }
   0x8   :  { %s1700_s8 = smov [#allocation3]  }
   0x9   :  { %14 = dma.hbm_to_smem %s2281_s0, 16, %s1700_s8, [#allocation2] }
   0xa   :  { %1622 = dma.done.wait [#allocation2], 16 }
   0xb   :  { %1623 = vsyncadd [#allocation2], 4294967280 }
   0xc   :  { %16 = sfence }
   0xd   :  { %17 = vsyncpa [#allocation5], 0 }
   0xe   :  { %19 = vsyncpa [#allocation5 + $0x1], 0 }
   0xf   :  { %20 = vsyncpa [#allocation8], 0 }
  0x10   :  { %22 = vsyncpa [#allocation8 + $0x1], 0 }
  0x11   :  { %23 = vsyncpa [#allocation11], 0 }
  0x12   :  { %24 = vsyncpa [#allocation6], 0 }
  0x13   :  { %26 = vsyncpa [#allocation6 + $0x1], 0 }
  0x14   :  { %27 = vsyncpa [#allocation14], 0 }
  0x15   :  { %29 = vsyncpa [#allocation14 + $0x1], 0  ;;  %s1795_s11 = smov 0   ;;  %s1797_s12 = smov 0  }
  0x16   :  { %s1799_s13 = smov 0   ;;  %s1801_s14 = smov 0  }
  0x17   :  { %s1803_s0 = smov 0   ;;  %s1805_s15 = smov 0  }
  0x18   :  { %s1807_s16 = smov 0   ;;  %s1809_s17 = smov 0  }
  0x19   :  { %s1811_s18 = smov 0   ;;  %s1813_s19 = smov 0  }
  0x1a   :  { %s1815_s20 = smov 0   ;;  %s1817_s21 = smov 0  }
  0x1b   :  { %s1819_s22 = smov 0  }
  0x1c LB: > { %2312 = sst [smem:[#allocation41_spill]] %s1650_s11  ;;  %s1857_s23 = sadd.s32 4294967295, %s1698_s22   ;;  %s1698_s22 = sphi %s1819_s22, %s2357_s22   ;;  %s1694_s21 = sphi %s1817_s21, %s2365_s21   ;;  %s1690_s20 = sphi %s1815_s20, %s2373_s20   ;;  %s1686_s19 = sphi %s1813_s19, %s2372_s19   ;;  %s1682_s18 = sphi %s1811_s18, %s2371_s18   ;;  %s1678_s17 = sphi %s1809_s17, %s2370_s17   ;;  %s1674_s16 = sphi %s1807_s16, %s2369_s16   ;;  %s1670_s15 = sphi %s1805_s15, %s2368_s15   ;;  %s1666_s0 = sphi %s1803_s0, %s2367_s0   ;;  %s1662_s14 = sphi %s1801_s14, %s2361_s14   ;;  %s1658_s13 = sphi %s1799_s13, %s2360_s13   ;;  %s1654_s12 = sphi %s1797_s12, %s2359_s12   ;;  %s1650_s11 = sphi %s1795_s11, %s2358_s11  }
  0x1d   : > { %2313 = sst [smem:[#allocation42_spill]] %s1654_s12  ;;  %s1861_s25 = sadd.s32 1, %s1698_s22  }
  0x1e   : > { %2314 = sst [smem:[#allocation43_spill]] %s1658_s13  ;;  %s44_s28 = sadd.s32 1, %s1694_s21 }
  0x1f   : > { %2315 = sst [smem:[#allocation44_spill]] %s1666_s0  ;;  %p51_p3 = scmp.ne.s32.totalorder %s1694_s21, %s1690_s20 }
  0x20   : > { %2316 = sst [smem:[#allocation45_spill]] %s1694_s21  ;;  %p52_p4 = scmp.eq.s32.totalorder %s1698_s22, 0 }
  0x21   : > { %2317 = sst [smem:[#allocation46_spill]] %s1861_s25  ;;  %p57_p5 = scmp.ne.s32.totalorder %s1690_s20, %s1686_s19 }
  0x22   : > { %s39_s26 = sld [smem:[#allocation3 + %s1698_s22]]  ;;  %p2291_p6 = scmp.eq.s32.totalorder %s1857_s23, 0 }
  0x23   : > { %s40_s27 = sld [smem:[#allocation3 + %s1861_s25]]  ;;  %p1873_p7 = por %p52_p4, %p51_p3 }
  0x24   : > { %s67_s30 = sld [smem:[#allocation3 + %s1698_s22]]  ;;  %p1880_p8 = por %p2291_p6, %p57_p5 }
  0x25   : > { %s2318_s29 = scalar_select %p1873_p7, 1, 0 }
  0x26   : > { %s2319_s8 = scalar_select %p1880_p8, 1, 0 }
  0x27   : > { %s68_s9 = sld [smem:[#allocation3 + %s1861_s25]]  ;;  %s72_s10 = sadd.s32 1, %s1682_s18 }
  0x28   : > { %p79_p9 = scmp.ne.s32.totalorder %s1682_s18, %s1678_s17  ;;  %p85_p10 = scmp.ne.s32.totalorder %s1678_s17, %s1674_s16 }
  0x29   : > { %s41_s19 = ssub.s32 %s39_s26, %s40_s27  ;;  %s95_s6 = sld [smem:[#allocation3 + %s1698_s22]] }
  0x2a   : > { %p42_p11 = scmp.eq.s32.totalorder %s41_s19, 0  ;;  %p1891_p12 = por %p79_p9, %p52_p4 }
  0x2b   : > { %p1897_p13 = por %p85_p10, %p2291_p6  ;;  %s96_s16 = sld [smem:[#allocation3 + %s1861_s25]] }
  0x2c   : > { %s2320_s24 = scalar_select %p1891_p12, 1, 0 }
  0x2d   : > { %s2321_s7 = scalar_select %p1897_p13, 1, 0 }
  0x2e   : > { %s1903_s5 = scalar_select %p42_p11, %s1694_s21, %s44_s28  }
  0x2f   : > { %s69_s26 = ssub.s32 %s67_s30, %s68_s9  ;;  %s100_s27 = sadd.s32 1, %s1670_s15 }
  0x30   : > { %2322 = sst [smem:[#allocation47_spill]] %s1903_s5  ;;  %p70_p0 = scmp.eq.s32.totalorder %s69_s26, 0 }
  0x31   : > { %p107_p1 = scmp.ne.s32.totalorder %s1670_s15, %s1666_s0  ;;  %p113_p2 = scmp.ne.s32.totalorder %s1666_s0, %s1662_s14 }
  0x32   : > { %s1912_s19 = scalar_select %p70_p0, %s1682_s18, %s72_s10  }
  0x33   : > { %p1916_p3 = por %p107_p1, %p52_p4  ;;  %p1922_p5 = por %p113_p2, %p2291_p6 }
  0x34   : > { %2323 = sst [smem:[#allocation48_spill]] %s1912_s19  ;;  %s144_s9 = ssub.s32 %s1698_s22, %s1861_s25 }
  0x35   : > { %s2324_s28 = scalar_select %p1916_p3, 1, 0 }
  0x36   : > { %s2325_s30 = scalar_select %p1922_p5, 1, 0 }
  0x37   : > { %s147_s26 = sadd.s32 1, %s1658_s13  ;;  %s97_s5 = ssub.s32 %s95_s6, %s96_s16 }
  0x38   : > { %p145_p9 = scmp.eq.s32.totalorder %s144_s9, 0  ;;  %p98_p10 = scmp.eq.s32.totalorder %s97_s5, 0 }
  0x39   : > { %p157_p11 = scmp.ne.s32.totalorder %s1658_s13, %s1654_s12  ;;  %p158_p4 = scmp.eq.s32.totalorder %s1857_s23, 4 }
  0x3a   : > { %s1932_s14 = scalar_select %p145_p9, %s1658_s13, %s147_s26  }
  0x3b   : > { %s1935_s10 = scalar_select %p98_p10, %s1670_s15, %s100_s27  }
  0x3c   : > { %2326 = sst [smem:[#allocation49_spill]] %s1932_s14  ;;  %p163_p0 = scmp.ne.s32.totalorder %s1654_s12, %s1650_s11 }
  0x3d   : > { %2327 = sst [smem:[#allocation50_spill]] %s1935_s10  ;;  %s2328_s19 = sadd.s32 4294967294, %s1698_s22  }
  0x3e   : > { %p164_p1 = scmp.eq.s32.totalorder %s2328_s19, 4  ;;  %p1170_p13 = scmp.ge.s32.totalorder %s1698_s22, 1 }
  0x3f   : > { %p1943_p2 = por %p158_p4, %p157_p11  ;;  %p223_p6 = scmp.lt.s32.totalorder %s1698_s22, 6 }
  0x40   : > { %p1948_p5 = por %p164_p1, %p163_p0  ;;  %s1701_s16 = smov [#allocation10]  }
  0x41   : > { %s2329_s0 = scalar_select %p1943_p2, 1, 0 }
  0x42   : > { %s2331_s6 = scalar_select %p1948_p5, 1, 0 }
  0x43   : > { %2330 = sst [smem:[#allocation51_spill]] %s2329_s0  ;;  %p1952_p8 = pnand %p1170_p13, %p223_p6 }
  0x44   : > { %2332 = sst [smem:[#allocation52_spill]] %s2331_s6  ;;  %s235_s27 = sshll.u32 %s1701_s16, 4  ;;  %s236_s27 = int_to_ptr.vmem [resolvable:$true] %s235_s27 }
  0x45   : > { %s2333_s5 = scalar_select %p1952_p8, 1, 0 }
  0x46   : > { %p1368_p9 = pneg %p1952_p8  ;;  %p2334_p10 = scmp.eq.s32.totalorder %s1857_s23, 0 }
  0x47   : > { %s2336_s4 = sld [smem:[#allocation53_spill]] }
  0x48   : > { %p1960_p11 = pnand %p1368_p9, %p2334_p10 }
  0x4a   : > { %p1544_p13 = pneg %p1960_p11 }
  0x4d   : > { %s1542_s10 = scalar_lea.hbm %s2336_s4, 256 }
  0x4e   : > { %p1543_p6 = scmp.ne.s32.totalorder %s2336_s4, %s1542_s10  ;;  %p1549_p1 = scmp.lt.u32.totalorder %s1542_s10, %s2336_s4 }
  0x50   : > { %p1545_p4 = pnand %p1544_p13, %p1543_p6 }
  0x52   : > { %p1546_p0 = pneg %p1545_p4 }
  0x54   : > { %p1551_p9 = pnand %p1549_p1, %p1546_p0 }
  0x56   : > { %1554 = shalt.err (!%p1551_p9)
}
  0x57   : > { %s1555_s6 = scalar_lea.vmem %s236_s27, 256  ;;  %p1563_p8 = scmp.lt.s32.totalorder %s236_s27, %s236_s27 }
  0x58   : > { %p1556_p10 = scmp.ne.s32.totalorder %s236_s27, %s1555_s6  ;;  %p1564_p3 = scmp.lt.s32.totalorder %s1555_s6, %s1555_s6 }
  0x5a   : > { %p1558_p5 = pnand %p1556_p10, %p1544_p13  ;;  %p1565_p12 = por %p1564_p3, %p1563_p8 }
  0x5c   : > { %p1559_p2 = pneg %p1558_p5 }
  0x5e   : > { %p1566_p7 = pnand %p1565_p12, %p1559_p2 }
  0x60   : > { %1569 = shalt.err (!%p1566_p7)
}
  0x61   : > { %s1702_s13 = smov 128   ;;  %s1703_s14 = smov 8  }
  0x62   : > { %1371 = dma.hbm_to_vmem [thread:$0]  (!%p1960_p11), %s2336_s4, 256, %s236_s27, [#allocation11], %s1702_s13, %s1702_s13, %s1703_s14  }
  0x63   : > { %p1172_p6 = scmp.ge.s32.totalorder %s1698_s22, 5 }
  0x65   : > { %245 = sbr.rel (%p1172_p6) target bundleno = 159 (0x9f), region = 20 }
  0x6c   : > { %s249_s25 = sand.u32 1, %s1694_s21   ;;  %s1704_s6 = smov 1280  }
  0x6d   : > { %s1173_s10 = sshll.u32 %s249_s25, 5  ;;  %p2337_p7 = scmp.ne.s32.totalorder %s2318_s29, 0 }
  0x6e   : > { %s253_s14 = scalar_lea.vmem [#allocation4], %s1173_s10  ;;  %s1705_s4 = smov 256  }
  0x6f   : > { %1312 = sst [smem:[#allocation17]] (%p2337_p7), %s1704_s6  ;;  %s273_s9 = sshll.u32 %s253_s14, 4  ;;  %s274_s9 = int_to_ptr.vmem [resolvable:$true] %s273_s9 }
  0x70   : > { %s1309_s27 = scalar_select %p2337_p7, [#allocation3], [#allocation28] }
  0x71   : > { %s1310_s19 = scalar_select %p2337_p7, %s1698_s22, 0 }
  0x72   : > { %s1311_s16 = scalar_select %p2337_p7, [#allocation0], [#allocation29] }
  0x73   : > { %s254_s13 = sld [smem:[%s1309_s27 + %s1310_s19]]  ;;  %s1706_s21 = smov 2  }
  0x74   : > { %s265_s26 = sld [smem:[%s1311_s16]]   ;;  %s1707_s6 = smov 128  }
  0x75   : > { %1313 = sst [smem:[#allocation17 + $0x1]] (%p2337_p7), %s1705_s4  ;;  %s1708_s14 = smov 8  }
  0x76   : > { %1314 = sst [smem:[#allocation17 + $0x2]] (%p2337_p7), %s1706_s21  ;;  %s250_s12 = scalar_lea.sflag [#allocation5], %s249_s25 }
  0x77   : > { %1315 = sst [smem:[#allocation17 + $0x3]] (%p2337_p7), %s1707_s6  ;;  %s1709_s4 = smov [#allocation16]  }
  0x78   : > { %1316 = sst [smem:[#allocation17 + $0x4]] (%p2337_p7), %s1707_s6 }
  0x79   : > { %s1229_s11 = sshll.u32 %s254_s13, 8  ;;  %1317 = sst [smem:[#allocation17 + $0x5]] (%p2337_p7), %s1708_s14 }
  0x7a   : > { %s260_s10 = scalar_lea.hbm %s2282_s1, %s1229_s11  ;;  %s1176_s19 = sshll.u32 %s265_s26, 26 }
  0x7b   : > { %s1177_s16 = sadd.s32 134217728, %s1176_s19 }
  0x7c   : > { %1318 = dma.general (%p2337_p7), %s260_s10, 512, %s274_s9, %s250_s12, %s1709_s4, [#allocation17], %s1177_s16, 0  }
  0x7d   : > { %s296_s21 = sand.u32 1, %s1698_s22   ;;  %s298_s11 = sand.u32 1, %s1682_s18  }
  0x7e   : > { %s1178_s0 = sshll.u32 %s298_s11, 6  ;;  %p2338_p8 = scmp.ne.s32.totalorder %s2320_s24, 0 }
  0x7f   : > { %s300_s9 = scalar_lea.vmem [#allocation7], %s1178_s0  ;;  %s1710_s27 = smov 2560  }
  0x80   : > { %s1319_s13 = scalar_select %p2338_p8, [#allocation3], [#allocation30] }
  0x81   : > { %s1320_s25 = scalar_select %p2338_p8, %s1698_s22, 0 }
  0x82   : > { %s1321_s12 = scalar_select %p2338_p8, [#allocation0], [#allocation31] }
  0x83   : > { %s301_s29 = sld [smem:[%s1319_s13 + %s1320_s25]]  ;;  %s321_s26 = sshll.u32 %s300_s9, 4  ;;  %s322_s26 = int_to_ptr.vmem [resolvable:$true] %s321_s26 }
  0x84   : > { %s313_s6 = sld [smem:[%s1321_s12]]   ;;  %s1711_s10 = smov 512  }
  0x85   : > { %1322 = sst [smem:[#allocation19]] (%p2338_p8), %s1710_s27  ;;  %s1712_s19 = smov 4  }
  0x86   : > { %1323 = sst [smem:[#allocation19 + $0x1]] (%p2338_p8), %s1711_s10  ;;  %s1713_s16 = smov 128  }
  0x87   : > { %1324 = sst [smem:[#allocation19 + $0x2]] (%p2338_p8), %s1712_s19  ;;  %s1714_s12 = smov 8  }
  0x88   : > { %1325 = sst [smem:[#allocation19 + $0x3]] (%p2338_p8), %s1713_s16  ;;  %s2030_s9 = scalar_lea.sflag [#allocation8], %s296_s21 }
  0x89   : > { %s1231_s14 = sshll.u32 %s301_s29, 9  ;;  %1326 = sst [smem:[#allocation19 + $0x4]] (%p2338_p8), %s1713_s16 }
  0x8a   : > { %s308_s0 = scalar_lea.hbm %s2283_s2, %s1231_s14  ;;  %s1182_s13 = sshll.u32 %s313_s6, 26 }
  0x8b   : > { %s1183_s25 = sadd.s32 134217728, %s1182_s13  ;;  %1327 = sst [smem:[#allocation19 + $0x5]] (%p2338_p8), %s1714_s12 }
  0x8c   : > { %s1715_s27 = smov [#allocation18]  }
  0x8d   : > { %1328 = dma.general (%p2338_p8), %s308_s0, 1024, %s322_s26, %s2030_s9, %s1715_s27, [#allocation19], %s1183_s25, 0  }
  0x8e   : > { %s346_s29 = sand.u32 1, %s1670_s15   ;;  %s1716_s10 = smov 1280  }
  0x8f   : > { %s1184_s6 = sshll.u32 %s346_s29, 5  ;;  %p2339_p12 = scmp.ne.s32.totalorder %s2324_s28, 0 }
  0x90   : > { %s348_s16 = scalar_lea.vmem [#allocation9], %s1184_s6  ;;  %s1717_s11 = smov 256  }
  0x91   : > { %1332 = sst [smem:[#allocation21]] (%p2339_p12), %s1716_s10  ;;  %s368_s14 = sshll.u32 %s348_s16, 4  ;;  %s369_s14 = int_to_ptr.vmem [resolvable:$true] %s368_s14 }
  0x92   : > { %s1329_s21 = scalar_select %p2339_p12, [#allocation3], [#allocation32] }
  0x93   : > { %s1330_s24 = scalar_select %p2339_p12, %s1698_s22, 0 }
  0x94   : > { %s1331_s26 = scalar_select %p2339_p12, [#allocation0], [#allocation33] }
  0x95   : > { %s349_s19 = sld [smem:[%s1329_s21 + %s1330_s24]]  ;;  %s1718_s0 = smov 2  }
  0x96   : > { %s360_s4 = sld [smem:[%s1331_s26]]   ;;  %s1719_s13 = smov 128  }
  0x97   : > { %1333 = sst [smem:[#allocation21 + $0x1]] (%p2339_p12), %s1717_s11  ;;  %s1720_s12 = smov 8  }
  0x98   : > { %1334 = sst [smem:[#allocation21 + $0x2]] (%p2339_p12), %s1718_s0  ;;  %s1721_s24 = smov [#allocation20]  }
  0x99   : > { %1335 = sst [smem:[#allocation21 + $0x3]] (%p2339_p12), %s1719_s13 }
  0x9a   : > { %1336 = sst [smem:[#allocation21 + $0x4]] (%p2339_p12), %s1719_s13 }
  0x9b   : > { %s1232_s25 = sshll.u32 %s349_s19, 8  ;;  %1337 = sst [smem:[#allocation21 + $0x5]] (%p2339_p12), %s1720_s12 }
  0x9c   : > { %s355_s6 = scalar_lea.hbm %s2284_s3, %s1232_s25  ;;  %s1187_s10 = sshll.u32 %s360_s4, 26 }
  0x9d   : > { %s1188_s21 = sadd.s32 134217728, %s1187_s10 }
  0x9e   : > { %1338 = dma.general (%p2339_p12), %s355_s6, 512, %s369_s14, %s2030_s9, %s1721_s24, [#allocation21], %s1188_s21, 0  }
  0x9f PF: > { %p2340_p3 = scmp.ne.s32.totalorder %s2333_s5, 0 }
  0xa0   : > { %s395_s26 = sand.u32 (!%p2340_p3), 1, %s1690_s20   ;;  %p2341_p5 = scmp.ne.s32.totalorder (!%p2340_p3), %s2319_s8, 0 }
  0xa1   : > { %393 = sbr.rel (%p2340_p3) target bundleno = 455 (0x1c7), region = 36  ;;  %s1190_s19 = sshll.u32 (!%p2340_p3), %s395_s26, 5 }
  0xa2   : > { %s396_s16 = scalar_lea.sflag (!%p2340_p3), [#allocation5], %s395_s26  ;;  %s2064_s11 = scalar_lea.vmem (!%p2340_p3), [#allocation4], %s1190_s19 }
  0xa8   : > { %1625 = dma.done.wait (%p2341_p5), %s396_s16, 512  }
  0xa9   : > { %1627 = vsyncadd (%p2341_p5), %s396_s16, 4294966784  ;;  %s404_s28 = sand.u32 1, %s1857_s23   ;;  %s406_s9 = sand.u32 1, %s1678_s17  }
  0xaa   : > { %s1191_s5 = sshll.u32 %s406_s9, 6  ;;  %s405_s14 = scalar_lea.sflag [#allocation8], %s404_s28 }
  0xab   : > { %s2074_s4 = scalar_lea.vmem [#allocation7], %s1191_s5  ;;  %p2342_p2 = scmp.ne.s32.totalorder %s2321_s7, 0 }
  0xad   : > { %1629 = dma.done.wait (%p2342_p2), %s405_s14, 1024  }
  0xae   : > { %1631 = vsyncadd (%p2342_p2), %s405_s14, 4294966272  ;;  %s2343_s0 = sld [smem:[#allocation44_spill]]  ;;  %p2344_p11 = scmp.ne.s32.totalorder %s2325_s30, 0 }
  0xb4   : > { %s415_s8 = sand.u32 1, %s2343_s0  }
  0xb5   : > { %s1192_s13 = sshll.u32 %s415_s8, 5 }
  0xb6   : > { %s2081_s25 = scalar_lea.vmem [#allocation9], %s1192_s13 }
  0xb7   : > { %1633 = dma.done.wait (%p2344_p11), %s405_s14, 512  }
  0xb8   : > { %1635 = vsyncadd (%p2344_p11), %s405_s14, 4294966784  ;;  %p2345_p13 = scmp.eq.s32.totalorder %s1857_s23, 0 }
  0xba   : > { %1637 = dma.done.wait (%p2345_p13), [#allocation11], 256   ;;  %p2346_p4 = pmov %p2345_p13 }
  0xbb   : > { %vm481_vm0 = vcmask 130048   ;;  %v475_v0 = vld [vmem:[#allocation10] sm:$0xff]  ;;  %v476_v1 = vld [vmem:[#allocation10 + $0x8] sm:$0xff]  ;;  %v479_v7 = vld [vmem:[%s2064_s11 + $0x10] sm:$0xff]  ;;  %s2347_s7 = sld [smem:[#allocation42_spill]]  ;;  %s2169_s24 = scalar_lea.sflag [#allocation14], %s404_s28 }
  0xbc   : > { %1639 = vsyncadd (%p2346_p4), [#allocation11], 4294967040  ;;  %v477_v2 = vld [vmem:[%s2064_s11] sm:$0xff]  ;;  %v1295_v3 = vpack.c.bf16 %v476_v1, %v475_v0  ;;  %v478_v5 = vld [vmem:[%s2064_s11 + $0x8] sm:$0xff] }
  0xbd   : > { %1263 = vmatprep.mubr.msk.f32.mxu0 %vm481_vm0, %v477_v2  ;;  %v583_v4 = vld [vmem:[%s2074_s4] sm:$0xff]  ;;  %v584_v6 = vld [vmem:[%s2074_s4 + $0x8] sm:$0xff]  ;;  %v585_v8 = vld [vmem:[%s2074_s4 + $0x10] sm:$0xff] }
  0xbe   : > { %1273 = vmatprep.mubr.msk.f32.mxu1 %vm481_vm0, %v583_v4  ;;  %1296 = vmatprep.subr.bf16.mxu0 %v1295_v3  ;;  %v480_v9 = vld [vmem:[%s2064_s11 + $0x18] sm:$0xff]  ;;  %v587_v11 = vld [vmem:[%s2074_s4 + $0x20] sm:$0xff]  ;;  %v588_v13 = vld [vmem:[%s2074_s4 + $0x28] sm:$0xff] }
  0xbf   : > { %1300 = vmatprep.subr.bf16.mxu1 %v1295_v3  ;;  %1298 = vmatpush3.bf16.msra.mxu0 %v1295_v3  ;;  %v586_v10 = vld [vmem:[%s2074_s4 + $0x18] sm:$0xff]  ;;  %v733_v12 = vld [vmem:[%s2081_s25] sm:$0xff]  ;;  %v734_v14 = vld [vmem:[%s2081_s25 + $0x8] sm:$0xff] }
  0xc0   : > { %1302 = vmatpush3.bf16.msra.mxu1 %v1295_v3  ;;  %1304 = vmatprep.subr.bf16.mxu0 %v1295_v3  ;;  %v589_v15 = vld [vmem:[%s2074_s4 + $0x30] sm:$0xff]  ;;  %v590_v17 = vld [vmem:[%s2074_s4 + $0x38] sm:$0xff] }
  0xc1   : > { %v735_v16 = vld [vmem:[%s2081_s25 + $0x10] sm:$0xff]  ;;  %v736_v18 = vld [vmem:[%s2081_s25 + $0x18] sm:$0xff]  ;;  %s2124_s30 = sand.u32 1, %s2347_s7  }
  0xc2   : > { %1264 = vmatmul.mubr.msk.f32.vlgmr.msra.gmra.mrb[0].mxu0 %vm481_vm0, %v478_v5  ;;  %s1194_s12 = sshll.u32 %s2124_s30, 5  ;;  %s1195_s27 = sshll.u32 %s2124_s30, 6 }
  0xc3   : > { %1274 = vmatmul.mubr.msk.f32.vlgmr.msra.gmra.mrb[0].mxu1 %vm481_vm0, %v584_v6  ;;  %1306 = vmatpush3.bf16.msra.mxu0 %v1295_v3  ;;  %s2128_s29 = scalar_lea.vmem [#allocation12], %s1194_s12  ;;  %s2134_s6 = scalar_lea.vmem [#allocation13], %s1195_s27 }
  0xc4   : > { %1266 = vmatprep.mubr.msk.f32.mxu0 %vm481_vm0, %v479_v7  ;;  %1276 = vmatprep.mubr.msk.f32.mxu1 %vm481_vm0, %v585_v8  ;;  %s2148_s10 = scalar_lea.vmem [#allocation15], %s1194_s12  ;;  %s839_s21 = scalar_lea.sflag [#allocation6], %s2124_s30 }
  0xc6   : > { %1267 = vmatmul.mubr.msk.f32.gmra.mrb[2].mxu0 %vm481_vm0, %v480_v9 }
  0xc7   : > { %1277 = vmatmul.mubr.msk.f32.gmra.mrb[2].mxu1 %vm481_vm0, %v586_v10  ;;  %1289 = vmatprep.mubr.msk.f32.mxu0 %vm481_vm0, %v733_v12 }
  0xc8   : > { %1279 = vmatprep.mubr.msk.f32.mxu1 %vm481_vm0, %v587_v11 }
  0xca   : > { %1290 = vmatmul.mubr.msk.f32.vlgmr.msra.gmra.mrb[4].mxu0 %vm481_vm0, %v734_v14 }
  0xcb   : > { %1280 = vmatmul.mubr.msk.f32.gmra.mrb[4].mxu1 %vm481_vm0, %v588_v13  ;;  %1292 = vmatprep.mubr.msk.f32.mxu0 %vm481_vm0, %v735_v16 }
  0xcc   : > { %1282 = vmatprep.mubr.msk.f32.mxu1 %vm481_vm0, %v589_v15 }
  0xce   : > { %1293 = vmatmul.mubr.msk.f32.gmra.mrb[6].mxu0 %vm481_vm0, %v736_v18 }
  0xcf   : > { %1283 = vmatmul.mubr.msk.f32.gmra.mrb[6].mxu1 %vm481_vm0, %v590_v17 }
 0x195   : > { %v1265_v19 = vpop.f32.mrb[0].mxu0 }
 0x196   : > { %v1275_v20 = vpop.f32.mrb[0].mxu1  ;;  %580 = vst.msk [vmem:[%s2128_s29 + $0x8] sm:$0xff] %vm481_vm0, %v1265_v19  ;;  %v560_v22 = vpop.f32.mrb[1].mxu0 }
 0x197   : > { %v721_v21 = vsub.f32 0.0, %v1275_v20  ;;  %v681_v23 = vpop.f32.mrb[1].mxu1  ;;  %579 = vst.msk [vmem:[%s2128_s29] sm:$0xff] %vm481_vm0, %v560_v22 }
 0x198   : > { %v720_v24 = vsub.f32 0.0, %v681_v23 }
 0x199   : > { %725 = vst.msk [vmem:[%s2134_s6 + $0x8] sm:$0xff] %vm481_vm0, %v721_v21  ;;  %v1268_v25 = vpop.f32.mrb[2].mxu0 }
 0x19a   : > { %724 = vst.msk [vmem:[%s2134_s6] sm:$0xff] %vm481_vm0, %v720_v24  ;;  %v1278_v26 = vpop.f32.mrb[2].mxu1  ;;  %582 = vst.msk [vmem:[%s2128_s29 + $0x18] sm:$0xff] %vm481_vm0, %v1268_v25  ;;  %v570_v27 = vpop.f32.mrb[3].mxu0 }
 0x19b   : > { %1210 = vst.msk [vmem:[%s2134_s6 + $0x18] sm:$0xff] %vm481_vm0, %v1278_v26  ;;  %v691_v28 = vpop.f32.mrb[3].mxu1  ;;  %581 = vst.msk [vmem:[%s2128_s29 + $0x10] sm:$0xff] %vm481_vm0, %v570_v27 }
 0x19c   : > { %1209 = vst.msk [vmem:[%s2134_s6 + $0x10] sm:$0xff] %vm481_vm0, %v691_v28 }
 0x19d   : > { %v1291_v30 = vpop.f32.mrb[4].mxu0 }
 0x19e   : > { %v1281_v29 = vpop.f32.mrb[4].mxu1  ;;  %835 = vst.msk [vmem:[%s2148_s10 + $0x8] sm:$0xff] %vm481_vm0, %v1291_v30  ;;  %v815_v33 = vpop.f32.mrb[5].mxu0 }
 0x19f   : > { %v723_v31 = vsub.f32 0.0, %v1281_v29  ;;  %v701_v32 = vpop.f32.mrb[5].mxu1  ;;  %834 = vst.msk [vmem:[%s2148_s10] sm:$0xff] %vm481_vm0, %v815_v33 }
 0x1a0   : > { %v722_v34 = vsub.f32 0.0, %v701_v32 }
 0x1a1   : > { %727 = vst.msk [vmem:[%s2134_s6 + $0x28] sm:$0xff] %vm481_vm0, %v723_v31  ;;  %v1294_v36 = vpop.f32.mrb[6].mxu0 }
 0x1a2   : > { %726 = vst.msk [vmem:[%s2134_s6 + $0x20] sm:$0xff] %vm481_vm0, %v722_v34  ;;  %v1284_v35 = vpop.f32.mrb[6].mxu1  ;;  %837 = vst.msk [vmem:[%s2148_s10 + $0x18] sm:$0xff] %vm481_vm0, %v1294_v36  ;;  %v825_v38 = vpop.f32.mrb[7].mxu0 }
 0x1a3   : > { %1212 = vst.msk [vmem:[%s2134_s6 + $0x38] sm:$0xff] %vm481_vm0, %v1284_v35  ;;  %v711_v37 = vpop.f32.mrb[7].mxu1  ;;  %836 = vst.msk [vmem:[%s2148_s10 + $0x10] sm:$0xff] %vm481_vm0, %v825_v38 }
 0x1a4   : > { %1211 = vst.msk [vmem:[%s2134_s6 + $0x30] sm:$0xff] %vm481_vm0, %v711_v37 }
 0x1a5   : > { %s2348_s26 = sld [smem:[#allocation51_spill]]  ;;  %s1233_s19 = sshll.u32 %s1857_s23, 8 }
 0x1a6   : > { %s878_s16 = sshll.u32 %s2128_s29, 4  ;;  %s2349_s5 = sld [smem:[#allocation54_spill]]  ;;  %s879_s16 = int_to_ptr.vmem [resolvable:$true] %s878_s16 }
 0x1a7   : > { %s1722_s28 = smov 256   ;;  %s1723_s4 = smov 1280  }
 0x1a8   : > { %s1724_s0 = smov 2   ;;  %s1725_s8 = smov 128  }
 0x1a9   : > { %s1726_s13 = smov 8   ;;  %s1727_s25 = smov [#allocation22]  }
 0x1aa   : > { %s1728_s7 = smov 0  }
 0x1ab   : > { %p2350_p0 = scmp.ne.s32.totalorder %s2348_s26, 0 }
 0x1ac   : > { %s861_s14 = scalar_lea.hbm %s2349_s5, %s1233_s19 }
 0x1ad   : > { %1344 = sst [smem:[#allocation23]] (%p2350_p0), %s1722_s28 }
 0x1ae   : > { %1345 = sst [smem:[#allocation23 + $0x1]] (%p2350_p0), %s1723_s4 }
 0x1af   : > { %1346 = sst [smem:[#allocation23 + $0x2]] (%p2350_p0), %s1724_s0 }
 0x1b0   : > { %1347 = sst [smem:[#allocation23 + $0x3]] (%p2350_p0), %s1725_s8 }
 0x1b1   : > { %1348 = sst [smem:[#allocation23 + $0x4]] (%p2350_p0), %s1725_s8 }
 0x1b2   : > { %1349 = sst [smem:[#allocation23 + $0x5]] (%p2350_p0), %s1726_s13 }
 0x1b3   : > { %1350 = dma.general (%p2350_p0), %s879_s16, 512, %s861_s14, %s839_s21, %s1727_s25, [#allocation23], %s1728_s7, 0  }
 0x1b4   : > { %s1235_s30 = sshll.u32 %s1857_s23, 9  ;;  %s924_s12 = sshll.u32 %s2134_s6, 4  ;;  %s925_s12 = int_to_ptr.vmem [resolvable:$true] %s924_s12 }
 0x1b5   : > { %s2351_s11 = sld [smem:[#allocation55_spill]]  ;;  %s1729_s5 = smov 512  }
 0x1b6   : > { %1351 = sst [smem:[#allocation25]] (%p2350_p0), %s1729_s5  ;;  %s1730_s21 = smov 2560  }
 0x1b7   : > { %1352 = sst [smem:[#allocation25 + $0x1]] (%p2350_p0), %s1730_s21  ;;  %s1731_s16 = smov 4  }
 0x1b8   : > { %1353 = sst [smem:[#allocation25 + $0x2]] (%p2350_p0), %s1731_s16  ;;  %s1732_s14 = smov 128  }
 0x1b9   : > { %1354 = sst [smem:[#allocation25 + $0x3]] (%p2350_p0), %s1732_s14  ;;  %s1733_s6 = smov 8  }
 0x1ba   : > { %1355 = sst [smem:[#allocation25 + $0x4]] (%p2350_p0), %s1732_s14  ;;  %s1734_s28 = smov [#allocation24]  }
 0x1bb   : > { %s907_s9 = scalar_lea.hbm %s2351_s11, %s1235_s30  ;;  %1356 = sst [smem:[#allocation25 + $0x5]] (%p2350_p0), %s1733_s6 }
 0x1bc   : > { %s1735_s4 = smov 0  }
 0x1bd   : > { %1357 = dma.general (%p2350_p0), %s925_s12, 1024, %s907_s9, %s2169_s24, %s1734_s28, [#allocation25], %s1735_s4, 0  }
 0x1be   : > { %s2352_s13 = sld [smem:[#allocation56_spill]]  ;;  %s969_s7 = sshll.u32 %s2148_s10, 4  ;;  %s970_s7 = int_to_ptr.vmem [resolvable:$true] %s969_s7 }
 0x1bf   : > { %s1736_s30 = smov 256   ;;  %s1737_s12 = smov 1280  }
 0x1c0   : > { %1358 = sst [smem:[#allocation27]] (%p2350_p0), %s1736_s30  ;;  %s1738_s23 = smov 2  }
 0x1c1   : > { %1359 = sst [smem:[#allocation27 + $0x1]] (%p2350_p0), %s1737_s12  ;;  %s1739_s27 = smov 128  }
 0x1c2   : > { %1360 = sst [smem:[#allocation27 + $0x2]] (%p2350_p0), %s1738_s23  ;;  %s1740_s29 = smov 8  }
 0x1c3   : > { %1361 = sst [smem:[#allocation27 + $0x3]] (%p2350_p0), %s1739_s27  ;;  %s1742_s10 = smov 0  }
 0x1c4   : > { %s952_s25 = scalar_lea.hbm %s2352_s13, %s1233_s19  ;;  %1362 = sst [smem:[#allocation27 + $0x4]] (%p2350_p0), %s1739_s27 }
 0x1c5   : > { %1363 = sst [smem:[#allocation27 + $0x5]] (%p2350_p0), %s1740_s29  ;;  %s1741_s19 = smov [#allocation26]  }
 0x1c6   : > { %1364 = dma.general (%p2350_p0), %s970_s7, 512, %s952_s25, %s2169_s24, %s1741_s19, [#allocation27], %s1742_s10, 0  }
 0x1c7 PF: > { %s2353_s11 = sld [smem:[#allocation41_spill]]  ;;  %s2354_s9 = sld [smem:[#allocation52_spill]] }
 0x1c8   : > { %p1384_p1 = scmp.ge.s32.totalorder %s1698_s22, 2 }
 0x1cd   : > { %s997_s5 = sand.u32 1, %s2353_s11   ;;  %p2355_p9 = scmp.ne.s32.totalorder %s2354_s9, 0 }
 0x1ce   : > { %s998_s21 = scalar_lea.sflag [#allocation6], %s997_s5 }
 0x1cf   : > { %p1373_p10 = pnand %p1384_p1, %p2355_p9 }
 0x1d1   : > { %1641 = dma.done.wait (!%p1373_p10), %s998_s21, 512  }
 0x1d2   : > { %1643 = vsyncadd (!%p1373_p10), %s998_s21, 4294966784  ;;  %s2356_s16 = sadd.s32 4294967294, %s1698_s22  }
 0x1d3   : > { %s1006_s14 = sand.u32 1, %s2356_s16  }
 0x1d4   : > { %s1007_s6 = scalar_lea.sflag [#allocation14], %s1006_s14 }
 0x1d5   : > { %1645 = dma.done.wait (!%p1373_p10), %s1007_s6, 1536  }
 0x1d6   : > { %1647 = vsyncadd (!%p1373_p10), %s1007_s6, 4294965760  ;;  %s2357_s22 = sld [smem:[#allocation46_spill]]  ;;  %s2358_s11 = sld [smem:[#allocation42_spill]] }
 0x1d7   : > { %s2359_s12 = sld [smem:[#allocation43_spill]]  ;;  %s2360_s13 = sld [smem:[#allocation49_spill]] }
 0x1d8   : > { %s2361_s14 = sld [smem:[#allocation44_spill]]  ;;  %s2362_s24 = sld [smem:[#allocation50_spill]] }
 0x1d9   : > { %s2363_s26 = sld [smem:[#allocation48_spill]]  ;;  %s2364_s28 = sld [smem:[#allocation45_spill]] }
 0x1da   : > { %s2365_s21 = sld [smem:[#allocation47_spill]]  ;;  %s2367_s0 = smov %s1670_s15 }
 0x1db   : > { %s2369_s16 = smov %s1678_s17  ;;  %s2370_s17 = smov %s1682_s18 }
 0x1dc   : > { %p32_p6 = scmp.ge.s32.totalorder %s2357_s22, 7   ;;  %s2372_s19 = smov %s1690_s20 }
 0x1de   : > { %s2368_s15 = smov %s2362_s24  ;;  %34 = sbr.rel (!%p32_p6) target bundleno = 28 (0x1c), region = 172 }
 0x1df   : > { %s2371_s18 = smov %s2363_s26  ;;  %s2373_s20 = smov %s2364_s28 }
 0x1e5   :  { %1021 = vsyncpa [#allocation5], 1 }
 0x1e6   :  { %1023 = vsyncpa [#allocation5 + $0x1], 1 }
 0x1e7   :  { %1024 = vsyncpa [#allocation8], 1 }
 0x1e8   :  { %1026 = vsyncpa [#allocation8 + $0x1], 1 }
 0x1e9   :  { %1027 = vsyncpa [#allocation11], 1 }
 0x1ea   :  { %1028 = vsyncpa [#allocation6], 1 }
 0x1eb   :  { %1030 = vsyncpa [#allocation6 + $0x1], 1 }
 0x1ec   :  { %1031 = vsyncpa [#allocation14], 1 }
 0x1ed   :  { %1033 = vsyncpa [#allocation14 + $0x1], 1 }

</bundles_post_ra>
